<compile_context>
chip_gen: v7x
topology: tpu7x:2x2x1
jax: 0.10.0
libtpu: 0.0.40
codegen_flags: <defaults>
</compile_context>

<pallas_src>
import functools
import math

import jax
import jax.numpy as jnp
from jax import lax
from jax.experimental import pallas as pl
from jax.experimental.pallas import tpu as pltpu


# --------------------------------------------------------------------------------------
# Kernel 1: fused QKV projection (bf16 operands, f32 accumulation) + KV cache emit.
# --------------------------------------------------------------------------------------
def _qkv_proj_kernel(x_ref, wqkv_ref, bqkv_ref, q_ref, kvs_ref, kvc_ref, *, num_heads):
    # x_ref:    (1, Tq, E)        bf16
    # wqkv_ref: (E, 3E)           bf16   (Q columns pre-scaled by 1/sqrt(D))
    # bqkv_ref: (1, 3E)           f32    (Q part pre-scaled by 1/sqrt(D))
    # q_ref:    (1, Tq, E)        bf16   lane-dense scaled-Q slab (one wide store)
    # kvs_ref:  (2, 1, H, Tq, D)  bf16   K/V stream consumed by the attention kernel
    # kvc_ref:  (2, 1, H, Tq, D)  f32    cached_kv module output
    E = x_ref.shape[2]
    H = num_heads
    D = E // H

    # One (Tq, E) @ (E, 3E) MXU matmul, f32 accumulation, f32 bias add.
    qkv = jnp.dot(x_ref[0], wqkv_ref[...],
                  preferred_element_type=jnp.float32) + bqkv_ref[...]    # (Tq, 3E) f32

    # Q stays lane-dense; heads are split read-side in kernel 2 (once per query block).
    q_ref[0, :, :] = qkv[:, :E].astype(jnp.bfloat16)

    # K/V are split into heads here because (2, B, H, S, D) is the required cache layout.
    for h in range(H):
        k_h = qkv[:, E + h * D:E + (h + 1) * D]
        v_h = qkv[:, 2 * E + h * D:2 * E + (h + 1) * D]
        kvc_ref[0, 0, h, :, :] = k_h
        kvc_ref[1, 0, h, :, :] = v_h
        kvs_ref[0, 0, h, :, :] = k_h.astype(jnp.bfloat16)
        kvs_ref[1, 0, h, :, :] = v_h.astype(jnp.bfloat16)


# --------------------------------------------------------------------------------------
# Kernel 2: flash attention (online softmax, triangular step grid) + dense projection.
# --------------------------------------------------------------------------------------
def _flash_attn_dense_kernel(qi_map, ki_map, q_ref, kv_ref, wd_ref, bd_ref, y_ref,
                             qh_sc, m_sc, l_sc, acc_sc,
                             *, block_q, block_k, num_heads):
    # qi_map, ki_map: SMEM (num_steps,) int32  (scalar prefetch: step -> (qi, ki))
    # q_ref:   (1, Tq, E)        bf16  lane-dense, already scaled by 1/sqrt(D)
    # kv_ref:  (2, 1, H, Tk, D)  bf16
    # wd_ref:  (E, E)            bf16
    # bd_ref:  (1, E)            f32
    # y_ref:   (1, Tq, E)        f32
    # qh_sc:   (H, Tq, D) bf16   head-major relayout of the current q tile
    # m_sc/l_sc: (H, Tq, 1) f32,  acc_sc: (H, Tq, D) f32
    t = pl.program_id(1)
    qi = qi_map[t]
    ki = ki_map[t]
    H = num_heads
    Tq = q_ref.shape[1]
    Tk = kv_ref.shape[3]
    D = q_ref.shape[2] // H
    last_k = ((qi + 1) * block_q - 1) // block_k   # last KV block for this query block

    @pl.when(ki == 0)
    def _init():
        # Head-split the lane-dense q tile once per query block (off the hot loop).
        for h in range(H):
            qh_sc[h, :, :] = q_ref[0, :, h * D:(h + 1) * D]
        m_sc[...] = jnp.full(m_sc.shape, -jnp.inf, dtype=jnp.float32)
        l_sc[...] = jnp.zeros(l_sc.shape, dtype=jnp.float32)
        acc_sc[...] = jnp.zeros(acc_sc.shape, dtype=jnp.float32)

    def _scores():
        # Head-batched q @ k^T (bf16 x bf16 -> f32); 1/sqrt(D) already folded into q.
        return jnp.einsum('hqd,hkd->hqk', qh_sc[...], kv_ref[0, 0],
                          preferred_element_type=jnp.float32)            # (H, Tq, Tk)

    def _update(s):
        # Online softmax update for all heads at once; softmax math stays f32.
        m_prev = m_sc[...]
        m_new = jnp.maximum(m_prev, s.max(axis=-1, keepdims=True))
        alpha = jnp.exp(m_prev - m_new)
        p = jnp.exp(s - m_new)
        l_sc[...] = alpha * l_sc[...] + p.sum(axis=-1, keepdims=True)
        acc_sc[...] = alpha * acc_sc[...] + jnp.einsum(
            'hqk,hkd->hqd', p.astype(jnp.bfloat16), kv_ref[1, 0],
            preferred_element_type=jnp.float32)
        m_sc[...] = m_new

    # KV blocks strictly below the diagonal need no causal mask.
    interior = (ki + 1) * block_k - 1 <= qi * block_q

    @pl.when(interior)
    def _compute_interior():
        _update(_scores())

    @pl.when(jnp.logical_not(interior))
    def _compute_diagonal():
        s = _scores()
        row = qi * block_q + lax.broadcasted_iota(jnp.int32, (Tq, Tk), 0)
        col = ki * block_k + lax.broadcasted_iota(jnp.int32, (Tq, Tk), 1)
        # Same semantics as attn*mask - 10000*(1-mask) in the reference module.
        s = jnp.where((row >= col)[None, :, :], s, -10000.0)
        _update(s)

    @pl.when(ki == last_k)
    def _finalize():
        attn = acc_sc[...] / l_sc[...]                          # exact normalization, f32
        # Relayout (H, Tq, D) -> (Tq, H*D) once, then ONE (Tq,E)@(E,E) MXU matmul.
        y2 = jnp.concatenate([attn[h] for h in range(H)], axis=-1)       # (Tq, E)
        y = jnp.dot(y2.astype(jnp.bfloat16), wd_ref[...],
                    preferred_element_type=jnp.float32)
        y_ref[0, :, :] = y + bd_ref[...]


# --------------------------------------------------------------------------------------
# Wrapper
# --------------------------------------------------------------------------------------
def gpt2_attention(x, w_qkv, b_qkv, w_dense, b_dense, num_heads,
                   *, block_q=None, block_k=None):
    """Forward pass of the Attention module (kv_cache=None path).

    x: [B, S, E]; w_qkv: [E, 3E]; b_qkv: [3E]; w_dense: [E, E]; b_dense: [E]
    Returns (y, cached_kv) with y: [B, S, E] f32, cached_kv: [2, B, H, S, D] f32.
    """
    B, S, E = x.shape
    H = num_heads
    assert E % H == 0
    D = E // H

    # 128 blocks match v5e's MXU; use 256 on v6e/v7x (2x256 MXU) for real GPT-2 sizes.
    if block_q is None:
        block_q = min(S, 128)
    if block_k is None:
        block_k = min(S, 128)
    assert S % block_q == 0 and S % block_k == 0
    num_q = S // block_q

    # Fold the 1/sqrt(D) attention scale into the Q projection (trace-time, amortized).
    scale = 1.0 / math.sqrt(D)
    w_qkv = jnp.concatenate([w_qkv[:, :E] * scale, w_qkv[:, E:]], axis=1)
    b_qkv = jnp.concatenate([b_qkv[:E] * scale, b_qkv[E:]])

    # bf16 matmul operands with f32 accumulation (MXU bf16 peak, half the HBM/VMEM traffic).
    x_bf16 = x.astype(jnp.bfloat16)
    w_qkv_bf16 = w_qkv.astype(jnp.bfloat16)
    b_qkv2 = b_qkv.reshape(1, 3 * E).astype(jnp.float32)
    w_dense_bf16 = w_dense.astype(jnp.bfloat16)
    b_dense2 = b_dense.reshape(1, E).astype(jnp.float32)

    vmem_limit = 32 * 1024 * 1024   # sized for v7x's 64 MiB VMEM; fine on v5e/v6e too

    # ---- kernel 1: fused QKV projection (emits lane-dense Q, bf16 KV stream, f32 cache) ----
    q_rows, kv_stream, cached_kv = pl.pallas_call(
        functools.partial(_qkv_proj_kernel, num_heads=H),
        out_shape=(
            jax.ShapeDtypeStruct((B, S, E), jnp.bfloat16),
            jax.ShapeDtypeStruct((2, B, H, S, D), jnp.bfloat16),
            jax.ShapeDtypeStruct((2, B, H, S, D), jnp.float32),
        ),
        grid=(B, num_q),
        in_specs=[
            pl.BlockSpec((1, block_q, E), lambda b, s: (b, s, 0)),        # x
            pl.BlockSpec((E, 3 * E), lambda b, s: (0, 0)),                # W_qkv (resident)
            pl.BlockSpec((1, 3 * E), lambda b, s: (0, 0)),                # b_qkv
        ],
        out_specs=(
            pl.BlockSpec((1, block_q, E), lambda b, s: (b, s, 0)),            # Q slab
            pl.BlockSpec((2, 1, H, block_q, D), lambda b, s: (0, b, 0, s, 0)),  # KV bf16
            pl.BlockSpec((2, 1, H, block_q, D), lambda b, s: (0, b, 0, s, 0)),  # cache f32
        ),
        compiler_params=pltpu.CompilerParams(
            dimension_semantics=("parallel", "parallel"),
            vmem_limit_bytes=vmem_limit,
        ),
    )(x_bf16, w_qkv_bf16, b_qkv2)

    # ---- kernel 2: flash attention over a triangular (qi, ki) step grid + dense ----
    # Only causally-valid (qi, ki) pairs become grid steps (~2x fewer steps than num_q*num_k).
    steps_q, steps_k = [], []
    for qi in range(num_q):
        lk = ((qi + 1) * block_q - 1) // block_k
        for ki in range(lk + 1):
            steps_q.append(qi)
            steps_k.append(ki)
    qi_map = jnp.asarray(steps_q, dtype=jnp.int32)
    ki_map = jnp.asarray(steps_k, dtype=jnp.int32)
    num_steps = len(steps_q)

    y = pl.pallas_call(
        functools.partial(_flash_attn_dense_kernel,
                          block_q=block_q, block_k=block_k, num_heads=H),
        out_shape=jax.ShapeDtypeStruct((B, S, E), jnp.float32),
        grid_spec=pltpu.PrefetchScalarGridSpec(
            num_scalar_prefetch=2,
            grid=(B, num_steps),
            in_specs=[
                pl.BlockSpec((1, block_q, E),
                             lambda b, t, qm, km: (b, qm[t], 0)),          # Q slab
                pl.BlockSpec((2, 1, H, block_k, D),
                             lambda b, t, qm, km: (0, b, 0, km[t], 0)),    # KV stream
                pl.BlockSpec((E, E), lambda b, t, qm, km: (0, 0)),         # W_dense
                pl.BlockSpec((1, E), lambda b, t, qm, km: (0, 0)),         # b_dense
            ],
            out_specs=pl.BlockSpec((1, block_q, E),
                                   lambda b, t, qm, km: (b, qm[t], 0)),
            scratch_shapes=[
                pltpu.VMEM((H, block_q, D), jnp.bfloat16),  # head-major q tile
                pltpu.VMEM((H, block_q, 1), jnp.float32),   # running max m
                pltpu.VMEM((H, block_q, 1), jnp.float32),   # running denom l
                pltpu.VMEM((H, block_q, D), jnp.float32),   # output accumulator
            ],
        ),
        compiler_params=pltpu.CompilerParams(
            # Batch axis is megacore-parallel; the triangular step axis carries the
            # online-softmax state so it must stay "arbitrary".  On v7x keep B (or
            # B*num_q via a different split) >= 2 so both TensorCores get work.
            dimension_semantics=("parallel", "arbitrary"),
            vmem_limit_bytes=vmem_limit,
        ),
    )(qi_map, ki_map, q_rows, kv_stream, w_dense_bf16, b_dense2)

    return y, cached_kv


# --------------------------------------------------------------------------------------
# Pure-JAX reference mirroring the PyTorch forward.
# --------------------------------------------------------------------------------------
def _reference(x, w_qkv, b_qkv, w_dense, b_dense, num_heads, *, matmul_dtype=None):
    """matmul_dtype=None -> exact f32.  matmul_dtype=bfloat16 mirrors the kernel's
    bf16-operand / f32-accumulate matmul precision."""
    if matmul_dtype is None:
        cast = lambda t: t
    else:
        cast = lambda t: t.astype(matmul_dtype)
    B, S, E = x.shape
    H = num_heads
    D = E // H
    qkv = jnp.dot(cast(x), cast(w_qkv), preferred_element_type=jnp.float32) + b_qkv
    q, k, v = jnp.split(qkv, 3, axis=2)

    def split_heads(t):
        return t.reshape(B, S, H, D).transpose(0, 2, 1, 3)    # (B, H, S, D)

    q, k, v = split_heads(q), split_heads(k), split_heads(v)
    cached_kv = jnp.stack([k, v])                              # (2, B, H, S, D)
    attn = jnp.einsum('bhqd,bhkd->bhqk', cast(q), cast(k),
                      preferred_element_type=jnp.float32) / math.sqrt(D)
    mask = jnp.tril(jnp.ones((S, S), jnp.float32)).reshape(1, 1, S, S)
    attn = attn * mask - 10000.0 * (1.0 - mask)
    attn = jax.nn.softmax(attn, axis=-1)
    y = jnp.einsum('bhqk,bhkd->bhqd', cast(attn), cast(v),
                   preferred_element_type=jnp.float32)
    y = y.transpose(0, 2, 1, 3).reshape(B, S, E)
    y = jnp.dot(cast(y), cast(w_dense), preferred_element_type=jnp.float32) + b_dense
    return y, cached_kv


if __name__ == "__main__":
    # Small shapes: batch=2, seq=8, embedding=32, heads=4 (head dim 8).
    B, S, E, H = 2, 8, 32, 4
    key = jax.random.PRNGKey(0)
    kx, k1, k2, k3, k4 = jax.random.split(key, 5)

    x = jax.random.normal(kx, (B, S, E), dtype=jnp.float32)
    w_qkv = jax.random.normal(k1, (E, 3 * E), dtype=jnp.float32) * (1.0 / math.sqrt(E))
    b_qkv = jax.random.normal(k2, (3 * E,), dtype=jnp.float32) * 0.02
    w_dense = jax.random.normal(k3, (E, E), dtype=jnp.float32) * (1.0 / math.sqrt(E))
    b_dense = jax.random.normal(k4, (E,), dtype=jnp.float32) * 0.02

    y, cached_kv = gpt2_attention(x, w_qkv, b_qkv, w_dense, b_dense, H)
    jax.block_until_ready((y, cached_kv))

    assert y.shape == (B, S, E)
    assert cached_kv.shape == (2, B, H, S, E // H)
    assert y.dtype == jnp.float32 and cached_kv.dtype == jnp.float32

    # Tight check vs. a precision-matched reference (bf16 matmul operands, f32 accum):
    # this catches logic errors without being sensitive to bf16 operand rounding.
    y_bf, kv_bf = _reference(x, w_qkv, b_qkv, w_dense, b_dense, H,
                             matmul_dtype=jnp.bfloat16)
    assert jnp.allclose(y, y_bf, atol=3e-2, rtol=3e-2)
    assert jnp.allclose(cached_kv, kv_bf, atol=1e-2, rtol=1e-2)

    # Coarse check vs. the exact f32 reference (mirrors the PyTorch module); the only
    # differences are bf16 rounding of the matmul operands.
    y_f32, kv_f32 = _reference(x, w_qkv, b_qkv, w_dense, b_dense, H)
    assert jnp.allclose(y, y_f32, atol=1e-1, rtol=1e-1)
    assert jnp.allclose(cached_kv, kv_f32, atol=5e-2, rtol=5e-2)

    print("KERNEL_OK")
</pallas_src>

<mosaic_0001>
module attributes {stable_mosaic.version = 11 : i64} {
  func.func @_qkv_proj_kernel(%arg0: i32, %arg1: i32, %arg2: memref<1x8x32xbf16, #tpu.memory_space<vmem>>, %arg3: memref<32x96xbf16, #tpu.memory_space<vmem>>, %arg4: memref<1x96xf32, #tpu.memory_space<vmem>>, %arg5: memref<1x8x32xbf16, #tpu.memory_space<vmem>>, %arg6: memref<2x1x4x8x8xbf16, #tpu.memory_space<vmem>>, %arg7: memref<2x1x4x8x8xf32, #tpu.memory_space<vmem>>) attributes {dimension_semantics = [#tpu.dimension_semantics<parallel>, #tpu.dimension_semantics<parallel>], iteration_bounds = array<i64: 2, 1>, scalar_prefetch = 0 : i64, scratch_operands = 0 : i64, tpu.core_type = #tpu.core_type<tc>, window_params = [{transform_indices = @transform_0, window_bounds = array<i64: 1, 8, 32>}, {pipeline_mode = #tpu.pipeline_mode<synchronous>, transform_indices = @transform_1, window_bounds = array<i64: 32, 96>}, {pipeline_mode = #tpu.pipeline_mode<synchronous>, transform_indices = @transform_2, window_bounds = array<i64: 1, 96>}, {transform_indices = @transform_3, window_bounds = array<i64: 1, 8, 32>}, {transform_indices = @transform_4, window_bounds = array<i64: 2, 1, 4, 8, 8>}, {transform_indices = @transform_5, window_bounds = array<i64: 2, 1, 4, 8, 8>}]} {
    %c0 = arith.constant 0 : index
    %c0_0 = arith.constant 0 : index
    %c0_1 = arith.constant 0 : index
    %0 = vector.load %arg2[%c0, %c0_0, %c0_1] : memref<1x8x32xbf16, #tpu.memory_space<vmem>>, vector<1x8x32xbf16>
    %1 = vector.shape_cast %0 : vector<1x8x32xbf16> to vector<8x32xbf16>
    %c0_2 = arith.constant 0 : index
    %c0_3 = arith.constant 0 : index
    %2 = vector.load %arg3[%c0_2, %c0_3] : memref<32x96xbf16, #tpu.memory_space<vmem>>, vector<32x96xbf16>
    %cst = arith.constant dense<0.000000e+00> : vector<8x96xf32>
    %3 = tpu.matmul %1, %2, %cst {dimension_numbers = #tpu.dot_dimension_numbers<[1], [0], [0], [1], [0, 0, 1, 1], [], []>} : vector<8x32xbf16>, vector<32x96xbf16>, vector<8x96xf32> -> vector<8x96xf32>
    %c0_4 = arith.constant 0 : index
    %c0_5 = arith.constant 0 : index
    %4 = vector.load %arg4[%c0_4, %c0_5] : memref<1x96xf32, #tpu.memory_space<vmem>>, vector<1x96xf32>
    %5 = vector.broadcast %4 : vector<1x96xf32> to vector<8x96xf32>
    %6 = arith.addf %3, %5 : vector<8x96xf32>
    %7 = vector.extract_strided_slice %6 {offsets = [0, 0], sizes = [8, 32], strides = [1, 1]} : vector<8x96xf32> to vector<8x32xf32>
    %8 = arith.truncf %7 : vector<8x32xf32> to vector<8x32xbf16>
    %c0_6 = arith.constant 0 : index
    %c0_7 = arith.constant 0 : index
    %c0_8 = arith.constant 0 : index
    %9 = vector.load %arg5[%c0_6, %c0_7, %c0_8] : memref<1x8x32xbf16, #tpu.memory_space<vmem>>, vector<1x8x32xbf16>
    %10 = vector.shape_cast %9 : vector<1x8x32xbf16> to vector<8x32xbf16>
    %11 = vector.shape_cast %8 : vector<8x32xbf16> to vector<1x8x32xbf16>
    tpu.vector_store %arg5[%c0_6, %c0_7, %c0_8], %11 {strides = array<i32>} : memref<1x8x32xbf16, #tpu.memory_space<vmem>>, vector<1x8x32xbf16>,
    %12 = vector.extract_strided_slice %6 {offsets = [0, 32], sizes = [8, 8], strides = [1, 1]} : vector<8x96xf32> to vector<8x8xf32>
    %13 = vector.extract_strided_slice %6 {offsets = [0, 64], sizes = [8, 8], strides = [1, 1]} : vector<8x96xf32> to vector<8x8xf32>
    %c0_9 = arith.constant 0 : index
    %c0_10 = arith.constant 0 : index
    %c0_11 = arith.constant 0 : index
    %c0_12 = arith.constant 0 : index
    %c0_13 = arith.constant 0 : index
    %14 = vector.load %arg7[%c0_9, %c0_10, %c0_11, %c0_12, %c0_13] : memref<2x1x4x8x8xf32, #tpu.memory_space<vmem>>, vector<1x1x1x8x8xf32>
    %15 = vector.shape_cast %14 : vector<1x1x1x8x8xf32> to vector<8x8xf32>
    %16 = vector.shape_cast %12 : vector<8x8xf32> to vector<1x1x1x8x8xf32>
    tpu.vector_store %arg7[%c0_9, %c0_10, %c0_11, %c0_12, %c0_13], %16 {strides = array<i32>} : memref<2x1x4x8x8xf32, #tpu.memory_space<vmem>>, vector<1x1x1x8x8xf32>,
    %c1 = arith.constant 1 : index
    %c0_14 = arith.constant 0 : index
    %c0_15 = arith.constant 0 : index
    %c0_16 = arith.constant 0 : index
    %c0_17 = arith.constant 0 : index
    %17 = vector.load %arg7[%c1, %c0_14, %c0_15, %c0_16, %c0_17] : memref<2x1x4x8x8xf32, #tpu.memory_space<vmem>>, vector<1x1x1x8x8xf32>
    %18 = vector.shape_cast %17 : vector<1x1x1x8x8xf32> to vector<8x8xf32>
    %19 = vector.shape_cast %13 : vector<8x8xf32> to vector<1x1x1x8x8xf32>
    tpu.vector_store %arg7[%c1, %c0_14, %c0_15, %c0_16, %c0_17], %19 {strides = array<i32>} : memref<2x1x4x8x8xf32, #tpu.memory_space<vmem>>, vector<1x1x1x8x8xf32>,
    %20 = arith.truncf %12 : vector<8x8xf32> to vector<8x8xbf16>
    %c0_18 = arith.constant 0 : index
    %c0_19 = arith.constant 0 : index
    %c0_20 = arith.constant 0 : index
    %c0_21 = arith.constant 0 : index
    %c0_22 = arith.constant 0 : index
    %21 = vector.load %arg6[%c0_18, %c0_19, %c0_20, %c0_21, %c0_22] : memref<2x1x4x8x8xbf16, #tpu.memory_space<vmem>>, vector<1x1x1x8x8xbf16>
    %22 = vector.shape_cast %21 : vector<1x1x1x8x8xbf16> to vector<8x8xbf16>
    %23 = vector.shape_cast %20 : vector<8x8xbf16> to vector<1x1x1x8x8xbf16>
    tpu.vector_store %arg6[%c0_18, %c0_19, %c0_20, %c0_21, %c0_22], %23 {strides = array<i32>} : memref<2x1x4x8x8xbf16, #tpu.memory_space<vmem>>, vector<1x1x1x8x8xbf16>,
    %24 = arith.truncf %13 : vector<8x8xf32> to vector<8x8xbf16>
    %c1_23 = arith.constant 1 : index
    %c0_24 = arith.constant 0 : index
    %c0_25 = arith.constant 0 : index
    %c0_26 = arith.constant 0 : index
    %c0_27 = arith.constant 0 : index
    %25 = vector.load %arg6[%c1_23, %c0_24, %c0_25, %c0_26, %c0_27] : memref<2x1x4x8x8xbf16, #tpu.memory_space<vmem>>, vector<1x1x1x8x8xbf16>
    %26 = vector.shape_cast %25 : vector<1x1x1x8x8xbf16> to vector<8x8xbf16>
    %27 = vector.shape_cast %24 : vector<8x8xbf16> to vector<1x1x1x8x8xbf16>
    tpu.vector_store %arg6[%c1_23, %c0_24, %c0_25, %c0_26, %c0_27], %27 {strides = array<i32>} : memref<2x1x4x8x8xbf16, #tpu.memory_space<vmem>>, vector<1x1x1x8x8xbf16>,
    %28 = vector.extract_strided_slice %6 {offsets = [0, 40], sizes = [8, 8], strides = [1, 1]} : vector<8x96xf32> to vector<8x8xf32>
    %29 = vector.extract_strided_slice %6 {offsets = [0, 72], sizes = [8, 8], strides = [1, 1]} : vector<8x96xf32> to vector<8x8xf32>
    %c0_28 = arith.constant 0 : index
    %c0_29 = arith.constant 0 : index
    %c1_30 = arith.constant 1 : index
    %c0_31 = arith.constant 0 : index
    %c0_32 = arith.constant 0 : index
    %30 = vector.load %arg7[%c0_28, %c0_29, %c1_30, %c0_31, %c0_32] : memref<2x1x4x8x8xf32, #tpu.memory_space<vmem>>, vector<1x1x1x8x8xf32>
    %31 = vector.shape_cast %30 : vector<1x1x1x8x8xf32> to vector<8x8xf32>
    %32 = vector.shape_cast %28 : vector<8x8xf32> to vector<1x1x1x8x8xf32>
    tpu.vector_store %arg7[%c0_28, %c0_29, %c1_30, %c0_31, %c0_32], %32 {strides = array<i32>} : memref<2x1x4x8x8xf32, #tpu.memory_space<vmem>>, vector<1x1x1x8x8xf32>,
    %c1_33 = arith.constant 1 : index
    %c0_34 = arith.constant 0 : index
    %c1_35 = arith.constant 1 : index
    %c0_36 = arith.constant 0 : index
    %c0_37 = arith.constant 0 : index
    %33 = vector.load %arg7[%c1_33, %c0_34, %c1_35, %c0_36, %c0_37] : memref<2x1x4x8x8xf32, #tpu.memory_space<vmem>>, vector<1x1x1x8x8xf32>
    %34 = vector.shape_cast %33 : vector<1x1x1x8x8xf32> to vector<8x8xf32>
    %35 = vector.shape_cast %29 : vector<8x8xf32> to vector<1x1x1x8x8xf32>
    tpu.vector_store %arg7[%c1_33, %c0_34, %c1_35, %c0_36, %c0_37], %35 {strides = array<i32>} : memref<2x1x4x8x8xf32, #tpu.memory_space<vmem>>, vector<1x1x1x8x8xf32>,
    %36 = arith.truncf %28 : vector<8x8xf32> to vector<8x8xbf16>
    %c0_38 = arith.constant 0 : index
    %c0_39 = arith.constant 0 : index
    %c1_40 = arith.constant 1 : index
    %c0_41 = arith.constant 0 : index
    %c0_42 = arith.constant 0 : index
    %37 = vector.load %arg6[%c0_38, %c0_39, %c1_40, %c0_41, %c0_42] : memref<2x1x4x8x8xbf16, #tpu.memory_space<vmem>>, vector<1x1x1x8x8xbf16>
    %38 = vector.shape_cast %37 : vector<1x1x1x8x8xbf16> to vector<8x8xbf16>
    %39 = vector.shape_cast %36 : vector<8x8xbf16> to vector<1x1x1x8x8xbf16>
    tpu.vector_store %arg6[%c0_38, %c0_39, %c1_40, %c0_41, %c0_42], %39 {strides = array<i32>} : memref<2x1x4x8x8xbf16, #tpu.memory_space<vmem>>, vector<1x1x1x8x8xbf16>,
    %40 = arith.truncf %29 : vector<8x8xf32> to vector<8x8xbf16>
    %c1_43 = arith.constant 1 : index
    %c0_44 = arith.constant 0 : index
    %c1_45 = arith.constant 1 : index
    %c0_46 = arith.constant 0 : index
    %c0_47 = arith.constant 0 : index
    %41 = vector.load %arg6[%c1_43, %c0_44, %c1_45, %c0_46, %c0_47] : memref<2x1x4x8x8xbf16, #tpu.memory_space<vmem>>, vector<1x1x1x8x8xbf16>
    %42 = vector.shape_cast %41 : vector<1x1x1x8x8xbf16> to vector<8x8xbf16>
    %43 = vector.shape_cast %40 : vector<8x8xbf16> to vector<1x1x1x8x8xbf16>
    tpu.vector_store %arg6[%c1_43, %c0_44, %c1_45, %c0_46, %c0_47], %43 {strides = array<i32>} : memref<2x1x4x8x8xbf16, #tpu.memory_space<vmem>>, vector<1x1x1x8x8xbf16>,
    %44 = vector.extract_strided_slice %6 {offsets = [0, 48], sizes = [8, 8], strides = [1, 1]} : vector<8x96xf32> to vector<8x8xf32>
    %45 = vector.extract_strided_slice %6 {offsets = [0, 80], sizes = [8, 8], strides = [1, 1]} : vector<8x96xf32> to vector<8x8xf32>
    %c0_48 = arith.constant 0 : index
    %c0_49 = arith.constant 0 : index
    %c2 = arith.constant 2 : index
    %c0_50 = arith.constant 0 : index
    %c0_51 = arith.constant 0 : index
    %46 = vector.load %arg7[%c0_48, %c0_49, %c2, %c0_50, %c0_51] : memref<2x1x4x8x8xf32, #tpu.memory_space<vmem>>, vector<1x1x1x8x8xf32>
    %47 = vector.shape_cast %46 : vector<1x1x1x8x8xf32> to vector<8x8xf32>
    %48 = vector.shape_cast %44 : vector<8x8xf32> to vector<1x1x1x8x8xf32>
    tpu.vector_store %arg7[%c0_48, %c0_49, %c2, %c0_50, %c0_51], %48 {strides = array<i32>} : memref<2x1x4x8x8xf32, #tpu.memory_space<vmem>>, vector<1x1x1x8x8xf32>,
    %c1_52 = arith.constant 1 : index
    %c0_53 = arith.constant 0 : index
    %c2_54 = arith.constant 2 : index
    %c0_55 = arith.constant 0 : index
    %c0_56 = arith.constant 0 : index
    %49 = vector.load %arg7[%c1_52, %c0_53, %c2_54, %c0_55, %c0_56] : memref<2x1x4x8x8xf32, #tpu.memory_space<vmem>>, vector<1x1x1x8x8xf32>
    %50 = vector.shape_cast %49 : vector<1x1x1x8x8xf32> to vector<8x8xf32>
    %51 = vector.shape_cast %45 : vector<8x8xf32> to vector<1x1x1x8x8xf32>
    tpu.vector_store %arg7[%c1_52, %c0_53, %c2_54, %c0_55, %c0_56], %51 {strides = array<i32>} : memref<2x1x4x8x8xf32, #tpu.memory_space<vmem>>, vector<1x1x1x8x8xf32>,
    %52 = arith.truncf %44 : vector<8x8xf32> to vector<8x8xbf16>
    %c0_57 = arith.constant 0 : index
    %c0_58 = arith.constant 0 : index
    %c2_59 = arith.constant 2 : index
    %c0_60 = arith.constant 0 : index
    %c0_61 = arith.constant 0 : index
    %53 = vector.load %arg6[%c0_57, %c0_58, %c2_59, %c0_60, %c0_61] : memref<2x1x4x8x8xbf16, #tpu.memory_space<vmem>>, vector<1x1x1x8x8xbf16>
    %54 = vector.shape_cast %53 : vector<1x1x1x8x8xbf16> to vector<8x8xbf16>
    %55 = vector.shape_cast %52 : vector<8x8xbf16> to vector<1x1x1x8x8xbf16>
    tpu.vector_store %arg6[%c0_57, %c0_58, %c2_59, %c0_60, %c0_61], %55 {strides = array<i32>} : memref<2x1x4x8x8xbf16, #tpu.memory_space<vmem>>, vector<1x1x1x8x8xbf16>,
    %56 = arith.truncf %45 : vector<8x8xf32> to vector<8x8xbf16>
    %c1_62 = arith.constant 1 : index
    %c0_63 = arith.constant 0 : index
    %c2_64 = arith.constant 2 : index
    %c0_65 = arith.constant 0 : index
    %c0_66 = arith.constant 0 : index
    %57 = vector.load %arg6[%c1_62, %c0_63, %c2_64, %c0_65, %c0_66] : memref<2x1x4x8x8xbf16, #tpu.memory_space<vmem>>, vector<1x1x1x8x8xbf16>
    %58 = vector.shape_cast %57 : vector<1x1x1x8x8xbf16> to vector<8x8xbf16>
    %59 = vector.shape_cast %56 : vector<8x8xbf16> to vector<1x1x1x8x8xbf16>
    tpu.vector_store %arg6[%c1_62, %c0_63, %c2_64, %c0_65, %c0_66], %59 {strides = array<i32>} : memref<2x1x4x8x8xbf16, #tpu.memory_space<vmem>>, vector<1x1x1x8x8xbf16>,
    %60 = vector.extract_strided_slice %6 {offsets = [0, 56], sizes = [8, 8], strides = [1, 1]} : vector<8x96xf32> to vector<8x8xf32>
    %61 = vector.extract_strided_slice %6 {offsets = [0, 88], sizes = [8, 8], strides = [1, 1]} : vector<8x96xf32> to vector<8x8xf32>
    %c0_67 = arith.constant 0 : index
    %c0_68 = arith.constant 0 : index
    %c3 = arith.constant 3 : index
    %c0_69 = arith.constant 0 : index
    %c0_70 = arith.constant 0 : index
    %62 = vector.load %arg7[%c0_67, %c0_68, %c3, %c0_69, %c0_70] : memref<2x1x4x8x8xf32, #tpu.memory_space<vmem>>, vector<1x1x1x8x8xf32>
    %63 = vector.shape_cast %62 : vector<1x1x1x8x8xf32> to vector<8x8xf32>
    %64 = vector.shape_cast %60 : vector<8x8xf32> to vector<1x1x1x8x8xf32>
    tpu.vector_store %arg7[%c0_67, %c0_68, %c3, %c0_69, %c0_70], %64 {strides = array<i32>} : memref<2x1x4x8x8xf32, #tpu.memory_space<vmem>>, vector<1x1x1x8x8xf32>,
    %c1_71 = arith.constant 1 : index
    %c0_72 = arith.constant 0 : index
    %c3_73 = arith.constant 3 : index
    %c0_74 = arith.constant 0 : index
    %c0_75 = arith.constant 0 : index
    %65 = vector.load %arg7[%c1_71, %c0_72, %c3_73, %c0_74, %c0_75] : memref<2x1x4x8x8xf32, #tpu.memory_space<vmem>>, vector<1x1x1x8x8xf32>
    %66 = vector.shape_cast %65 : vector<1x1x1x8x8xf32> to vector<8x8xf32>
    %67 = vector.shape_cast %61 : vector<8x8xf32> to vector<1x1x1x8x8xf32>
    tpu.vector_store %arg7[%c1_71, %c0_72, %c3_73, %c0_74, %c0_75], %67 {strides = array<i32>} : memref<2x1x4x8x8xf32, #tpu.memory_space<vmem>>, vector<1x1x1x8x8xf32>,
    %68 = arith.truncf %60 : vector<8x8xf32> to vector<8x8xbf16>
    %c0_76 = arith.constant 0 : index
    %c0_77 = arith.constant 0 : index
    %c3_78 = arith.constant 3 : index
    %c0_79 = arith.constant 0 : index
    %c0_80 = arith.constant 0 : index
    %69 = vector.load %arg6[%c0_76, %c0_77, %c3_78, %c0_79, %c0_80] : memref<2x1x4x8x8xbf16, #tpu.memory_space<vmem>>, vector<1x1x1x8x8xbf16>
    %70 = vector.shape_cast %69 : vector<1x1x1x8x8xbf16> to vector<8x8xbf16>
    %71 = vector.shape_cast %68 : vector<8x8xbf16> to vector<1x1x1x8x8xbf16>
    tpu.vector_store %arg6[%c0_76, %c0_77, %c3_78, %c0_79, %c0_80], %71 {strides = array<i32>} : memref<2x1x4x8x8xbf16, #tpu.memory_space<vmem>>, vector<1x1x1x8x8xbf16>,
    %72 = arith.truncf %61 : vector<8x8xf32> to vector<8x8xbf16>
    %c1_81 = arith.constant 1 : index
    %c0_82 = arith.constant 0 : index
    %c3_83 = arith.constant 3 : index
    %c0_84 = arith.constant 0 : index
    %c0_85 = arith.constant 0 : index
    %73 = vector.load %arg6[%c1_81, %c0_82, %c3_83, %c0_84, %c0_85] : memref<2x1x4x8x8xbf16, #tpu.memory_space<vmem>>, vector<1x1x1x8x8xbf16>
    %74 = vector.shape_cast %73 : vector<1x1x1x8x8xbf16> to vector<8x8xbf16>
    %75 = vector.shape_cast %72 : vector<8x8xbf16> to vector<1x1x1x8x8xbf16>
    tpu.vector_store %arg6[%c1_81, %c0_82, %c3_83, %c0_84, %c0_85], %75 {strides = array<i32>} : memref<2x1x4x8x8xbf16, #tpu.memory_space<vmem>>, vector<1x1x1x8x8xbf16>,
    return
  }
  func.func @transform_0(%arg0: i32, %arg1: i32) -> (i32, i32, i32) {
    %c0_i32 = arith.constant 0 : i32
    %c0_i32_0 = arith.constant 0 : i32
    return %arg0, %arg1, %c0_i32 : i32, i32, i32
  }
  func.func @transform_1(%arg0: i32, %arg1: i32) -> (i32, i32) {
    %c0_i32 = arith.constant 0 : i32
    %c0_i32_0 = arith.constant 0 : i32
    %c0_i32_1 = arith.constant 0 : i32
    return %c0_i32, %c0_i32_0 : i32, i32
  }
  func.func @transform_2(%arg0: i32, %arg1: i32) -> (i32, i32) {
    %c0_i32 = arith.constant 0 : i32
    %c0_i32_0 = arith.constant 0 : i32
    %c0_i32_1 = arith.constant 0 : i32
    return %c0_i32, %c0_i32_0 : i32, i32
  }
  func.func @transform_3(%arg0: i32, %arg1: i32) -> (i32, i32, i32) {
    %c0_i32 = arith.constant 0 : i32
    %c0_i32_0 = arith.constant 0 : i32
    return %arg0, %arg1, %c0_i32 : i32, i32, i32
  }
  func.func @transform_4(%arg0: i32, %arg1: i32) -> (i32, i32, i32, i32, i32) {
    %c0_i32 = arith.constant 0 : i32
    %c0_i32_0 = arith.constant 0 : i32
    %c0_i32_1 = arith.constant 0 : i32
    %c0_i32_2 = arith.constant 0 : i32
    return %c0_i32, %arg0, %c0_i32_0, %arg1, %c0_i32_1 : i32, i32, i32, i32, i32
  }
  func.func @transform_5(%arg0: i32, %arg1: i32) -> (i32, i32, i32, i32, i32) {
    %c0_i32 = arith.constant 0 : i32
    %c0_i32_0 = arith.constant 0 : i32
    %c0_i32_1 = arith.constant 0 : i32
    %c0_i32_2 = arith.constant 0 : i32
    return %c0_i32, %arg0, %c0_i32_0, %arg1, %c0_i32_1 : i32, i32, i32, i32, i32
  }
}

</mosaic_0001>

<bundles_post_ra>
// kernel: tpu_custom_call.1
= control target key start
LH: loop header
LB: loop body
LE: loop exit
PB: predicated region body
PF: predicated region fallthrough
CT: control target
= control target key end

     0   :  { %s1407_s0 = inlined_call_operand.hbm [shape: bf16[2,8,32], index: 0, kind: input, shape index: {}]   ;;  %s1408_s1 = inlined_call_operand.hbm [shape: bf16[32,96], index: 1, kind: input, shape index: {}]   ;;  %s1409_s2 = inlined_call_operand.vmem [shape: f32[1,96], index: 2, kind: input, shape index: {}]   ;;  %s1410_s3 = inlined_call_operand.hbm [shape: bf16[2,8,32], index: 3, kind: output, shape index: {0}]   ;;  %s1411_s4 = inlined_call_operand.hbm [shape: bf16[2,2,4,8,8], index: 4, kind: output, shape index: {1}]   ;;  %s1412_s5 = inlined_call_operand.hbm [shape: f32[2,2,4,8,8], index: 5, kind: output, shape index: {2}]  }
   0x1   :  { %1421 = sst [smem:[#allocation19_spill]] %s1407_s0 }
   0x2   :  { %11 = vsyncpa [#allocation3], 0 }
   0x3   :  { %13 = vsyncpa [#allocation3 + $0x1], 0 }
   0x4   :  { %14 = vsyncpa [#allocation6], 0 }
   0x5   :  { %15 = vsyncpa [#allocation4], 0 }
   0x6   :  { %17 = vsyncpa [#allocation4 + $0x1], 0 }
   0x7   :  { %18 = vsyncpa [#allocation9], 0 }
   0x8   :  { %20 = vsyncpa [#allocation9 + $0x1], 0  ;;  %s1108_s18 = smov 0   ;;  %s1110_s19 = smov 0  }
   0x9   :  { %s1112_s20 = smov 0   ;;  %s1114_s21 = smov 0  }
   0xa   :  { %s1116_s22 = smov 0   ;;  %s1118_s23 = smov 0  }
   0xb LB: > { %s1139_s24 = sadd.s32 4294967295, %s1048_s23   ;;  %s1416_s25 = sadd.s32 4294967294, %s1048_s23   ;;  %s1048_s23 = sphi %s1118_s23, %s26_s23   ;;  %s1044_s22 = sphi %s1116_s22, %s1446_s22   ;;  %s1040_s21 = sphi %s1114_s21, %s1445_s21   ;;  %s1036_s20 = sphi %s1112_s20, %s1444_s20   ;;  %s1032_s19 = sphi %s1110_s19, %s1443_s19   ;;  %s1028_s18 = sphi %s1108_s18, %s1442_s18  }
   0xc   : > { %p60_p0 = scmp.ne.s32.totalorder %s1032_s19, %s1028_s18  ;;  %p1413_p1 = scmp.eq.s32.totalorder %s1139_s24, 0 }
   0xd   : > { %p134_p3 = scmp.eq.s32.totalorder %s1416_s25, 1  ;;  %p724_p5 = scmp.ge.s32.totalorder %s1048_s23, 1 }
   0xe   : > { %p1150_p4 = por %p1413_p1, %p60_p0  ;;  %p197_p7 = scmp.lt.s32.totalorder %s1048_s23, 3 }
   0xf   : > { %p1155_p6 = por %p134_p3, %p60_p0  ;;  %s1050_s29 = smov [#allocation5]  }
  0x10   : > { %s1422_s26 = scalar_select %p1150_p4, 1, 0 }
  0x11   : > { %s1423_s27 = scalar_select %p1155_p6, 1, 0 }
  0x12   : > { %p1160_p8 = pnand %p724_p5, %p197_p7  ;;  %s209_s30 = sshll.u32 %s1050_s29, 4  ;;  %s210_s30 = int_to_ptr.vmem [resolvable:$true] %s209_s30 }
  0x13   : > { %s38_s7 = sadd.s32 1, %s1044_s22  ;;  %s900_s10 = scalar_lea.hbm %s1408_s1, 256 }
  0x14   : > { %s1424_s28 = scalar_select %p1160_p8, 1, 0 }
  0x15   : > { %p802_p9 = pneg %p1160_p8  ;;  %p901_p12 = scmp.ne.s32.totalorder %s1408_s1, %s900_s10 }
  0x16   : > { %p907_p5 = scmp.lt.u32.totalorder %s900_s10, %s1408_s1 }
  0x17   : > { %p1169_p11 = pnand %p802_p9, %p1413_p1 }
  0x19   : > { %p902_p13 = pneg %p1169_p11 }
  0x1b   : > { %p903_p0 = pnand %p902_p13, %p901_p12 }
  0x1d   : > { %p904_p3 = pneg %p903_p0 }
  0x1f   : > { %p909_p7 = pnand %p907_p5, %p904_p3 }
  0x21   : > { %912 = shalt.err (!%p909_p7)
}
  0x22   : > { %s913_s15 = scalar_lea.vmem %s210_s30, 256  ;;  %p921_p2 = scmp.lt.s32.totalorder %s210_s30, %s210_s30 }
  0x23   : > { %p914_p9 = scmp.ne.s32.totalorder %s210_s30, %s913_s15  ;;  %p922_p6 = scmp.lt.s32.totalorder %s913_s15, %s913_s15 }
  0x25   : > { %p916_p10 = pnand %p914_p9, %p902_p13  ;;  %p923_p4 = por %p922_p6, %p921_p2 }
  0x27   : > { %p917_p1 = pneg %p916_p10 }
  0x29   : > { %p924_p8 = pnand %p923_p4, %p917_p1 }
  0x2b   : > { %927 = shalt.err (!%p924_p8)
}
  0x2c   : > { %s1051_s16 = smov 64   ;;  %s1052_s17 = smov 4  }
  0x2d   : > { %805 = dma.hbm_to_vmem [thread:$0]  (!%p1169_p11), %s1408_s1, 256, %s210_s30, [#allocation6], %s1051_s16, %s1051_s16, %s1052_s17  }
  0x2e   : > { %p40_p1 = scmp.ge.s32.totalorder %s38_s7, 2  ;;  %s47_s9 = sadd.s32 1, %s1036_s20 }
  0x2f   : > { %p54_p2 = scmp.ne.s32.totalorder %s1036_s20, %s1032_s19  ;;  %p55_p4 = scmp.eq.s32.totalorder %s1048_s23, 0 }
  0x30   : > { %s1448_s7 = smov (%p40_p1, %s38_s7), 0  ;;  %p1427_p8 = scmp.eq.s32.totalorder %s1139_s24, 1 }
  0x31   : > { %p1196_p6 = por %p55_p4, %p54_p2  ;;  %s42_s6 = ssub.s32 %s1044_s22, %s1448_s7 }
  0x32   : > { %p1202_p10 = por %p1427_p8, %p54_p2  ;;  %p821_p12 = scmp.lt.s32.totalorder %s1048_s23, 2 }
  0x33   : > { %p45_p11 = scmp.eq.s32.totalorder %s42_s6, 0  ;;  %s226_s30 = sand.u32 1, %s1036_s20  }
  0x34   : > { %s727_s12 = sshll.u32 %s226_s30, 2  ;;  %s728_s14 = sshll.u32 %s1044_s22, 6 }
  0x35   : > { %s1211_s13 = scalar_select %p45_p11, %s1036_s20, %s47_s9  }
  0x36   : > { %s1429_s0 = sld [smem:[#allocation19_spill]]  ;;  %s230_s29 = scalar_lea.vmem [#allocation2], %s727_s12 }
  0x37   : > { %s238_s8 = sshll.u32 %s230_s29, 4  ;;  %p1223_p13 = pnand %p821_p12, %p1196_p6  ;;  %s1219_s8 = int_to_ptr.vmem [resolvable:$true] %s238_s8 }
  0x38   : > { %s227_s9 = scalar_lea.sflag [#allocation3], %s226_s30 }
  0x39   : > { %p930_p3 = pneg %p1223_p13 }
  0x3c   : > { %s1217_s17 = scalar_lea.hbm %s1429_s0, %s728_s14  ;;  %s933_s15 = scalar_lea.hbm %s1429_s0, 128 }
  0x3d   : > { %s928_s25 = scalar_lea.hbm %s1217_s17, 64  ;;  %p934_p9 = scmp.lt.u32.totalorder %s1217_s17, %s1429_s0 }
  0x3e   : > { %p929_p0 = scmp.ne.s32.totalorder %s1217_s17, %s928_s25  ;;  %p935_p1 = scmp.lt.u32.totalorder %s933_s15, %s928_s25 }
  0x3f   : > { %p937_p4 = scmp.lt.u32.totalorder %s928_s25, %s1217_s17 }
  0x40   : > { %p931_p5 = pnand %p930_p3, %p929_p0  ;;  %p936_p2 = por %p935_p1, %p934_p9 }
  0x42   : > { %p932_p7 = pneg %p931_p5  ;;  %p938_p6 = por %p937_p4, %p936_p2 }
  0x44   : > { %p939_p8 = pnand %p938_p6, %p932_p7 }
  0x46   : > { %942 = shalt.err (!%p939_p8)
}
  0x47   : > { %s943_s30 = scalar_lea.vmem %s1219_s8, 64  ;;  %s1053_s29 = smov [#allocation2]  }
  0x48   : > { %p944_p12 = scmp.ne.s32.totalorder %s1219_s8, %s943_s30  ;;  %s948_s12 = sshll.u32 %s1053_s29, 4  ;;  %s949_s12 = int_to_ptr.vmem [resolvable:$false] %s948_s12 }
  0x49   : > { %s950_s14 = scalar_lea.vmem %s949_s12, 128  ;;  %p951_p5 = scmp.lt.s32.totalorder %s1219_s8, %s949_s12 }
  0x4a   : > { %p946_p11 = pnand %p944_p12, %p930_p3  ;;  %p952_p9 = scmp.lt.s32.totalorder %s950_s14, %s943_s30 }
  0x4c   : > { %p947_p0 = pneg %p946_p11  ;;  %p953_p1 = por %p952_p9, %p951_p5 }
  0x4e   : > { %p954_p2 = pnand %p953_p1, %p947_p0 }
  0x50   : > { %957 = shalt.err (!%p954_p2)
}
  0x51   : > { %809 = dma.hbm_to_vmem [thread:$0]  (!%p1223_p13), %s1217_s17, 64, %s1219_s8, %s227_s9  }
  0x52   : > { %p1431_p7 = scmp.ne.s32.totalorder %s1424_s28, 0 }
  0x53   : > { %s1255_s25 = sand.u32 (!%p1431_p7), 1, %s1032_s19   ;;  %p1432_p3 = scmp.ne.s32.totalorder (!%p1431_p7), %s1422_s26, 0 }
  0x54   : > { %247 = sbr.rel (%p1431_p7) target bundleno = 495 (0x1ef), region = 32  ;;  %s730_s15 = sshll.u32 (!%p1431_p7), %s1255_s25, 2 }
  0x55   : > { %s250_s10 = scalar_lea.sflag (!%p1431_p7), [#allocation3], %s1255_s25  ;;  %s253_s16 = scalar_lea.vmem (!%p1431_p7), [#allocation2], %s730_s15 }
  0x5b   : > { %1011 = dma.done.wait (%p1432_p3), %s250_s10, 64  }
  0x5c   : > { %1013 = vsyncadd (%p1432_p3), %s250_s10, 4294967232  ;;  %p1433_p13 = scmp.eq.s32.totalorder %s1139_s24, 0 }
  0x5e   : > { %1015 = dma.done.wait (%p1433_p13), [#allocation6], 256   ;;  %p1434_p4 = pmov %p1433_p13 }
  0x5f   : > { %v1054_v0 = vmov 0.0   ;;  %vm1055_vm0 = vmmov 0   ;;  %v898_v1 = vld [vmem:[#allocation5] sm:$0xff]   ;;  %v899_v2 = vld [vmem:[#allocation5 + $0x8] sm:$0xff]   ;;  %v295_v3 = vld [vmem:[%s253_s16] sm:$0xf] }
  0x60   : > { %1017 = vsyncadd (%p1434_p4), [#allocation6], 4294967040  ;;  %770 = vmatprep.subr.bf16.mxu0 %v1054_v0  ;;  %774 = vmatprep.mubr.msk.bf16.mxu0 %vm1055_vm0, %v1054_v0  ;;  %vm319_vm1 = vcmask 261120   ;;  %v735_v4 = vld [vmem:[%s1409_s2] ss:$0 sm:$0xff]  ;;  %vm364_vm2 = vcmask 257024  }
  0x61   : > { %771 = vmatpush3.bf16.msra.mxu0 %v898_v1  ;;  %s1418_s17 = smov 56   ;;  %s1057_s8 = smov 96  }
  0x62   : > { %772 = vmatprep.subr.bf16.mxu0 %v1054_v0  ;;  %s279_s6 = scalar_lea.vmem [#allocation7], %s730_s15  ;;  %s1417_s9 = smov 48  }
  0x63   : > { %s1059_s30 = smov 64   ;;  %s1419_s29 = smov 40  }
  0x64   : > { %s1061_s12 = smov 88   ;;  %s1420_s14 = smov 80  }
  0x65   : > { %773 = vmatpush3.bf16.msra.mxu0 %v899_v2  ;;  %s757_s10 = sshll.u32 %s1040_s21, 6  ;;  %s475_s15 = sshll.u32 %s279_s6, 4  ;;  %s476_s15 = int_to_ptr.vmem [resolvable:$true] %s475_s15 }
  0x66   : > { %s455_s16 = sand.u32 1, %s1139_s24   ;;  %s958_s0 = scalar_lea.vmem %s476_s15, 64 }
  0x67   : > { %p959_p6 = scmp.ne.s32.totalorder %s476_s15, %s958_s0 }
  0x68   : > { %775 = vmatmul.mubr.msk.bf16.vlgmr.msra.gmra.mrb[0].mxu0 %vm319_vm1, %v295_v3 }
  0x69   : > { %p960_p8 = pnand %p959_p6, %p1202_p10 }
  0x6b   : > { %p961_p12 = pneg %p960_p8 }
 0x13b   : > { %v357_v5 = vpop.f32.mrb[0].mxu0 }
 0x13c   : > { %v358_v6 = vadd.f32 %v735_v4, %v357_v5  ;;  %v776_v7 = vpop.f32.mrb[1].mxu0 }
 0x13d   : > { %v360_v8 = vpop.f32.mrb[2].mxu0 }
 0x13e   : > { %395 = vrot.lane.b32.xlu1 %v358_v6, %s1418_s17  ;;  %367 = vrot.lane.b32.xlu0 %v358_v6, %s1057_s8  ;;  %v777_v9 = vpop.f32.mrb[3].mxu0  ;;  %v363_v10 = vpack.c.bf16 %v358_v6, %v358_v6  ;;  %s1063_s17 = smov 72  }
 0x140   : > { %365 = vst.msk [vmem:[%s279_s6] sm:$0xf] %vm364_vm2, %v363_v10 }
 0x142   : > { %415 = vrot.lane.b32.xlu1 %v358_v6, %s1417_s9  ;;  %372 = vrot.lane.b32.xlu0 %v358_v6, %s1059_s30  ;;  %s1284_s9 = scalar_lea.hbm %s1410_s3, %s757_s10 }
 0x146   : > { %435 = vrot.lane.b32.xlu1 %v358_v6, %s1419_s29  ;;  %390 = vrot.lane.b32.xlu0 %v358_v6, %s1061_s12  ;;  %s451_s29 = scalar_lea.sflag [#allocation4], %s1255_s25 }
 0x14a   : > { %410 = vrot.lane.b32.xlu0 %v358_v6, %s1420_s14  ;;  %380 = vrot.lane.b32.xlu1 %v363_v10, %s1057_s8  ;;  %s1064_s8 = smov [#allocation7]  }
 0x14b   : > { %s962_s14 = sshll.u32 %s1064_s8, 4  ;;  %s963_s14 = int_to_ptr.vmem [resolvable:$false] %s962_s14 }
 0x14c   : > { %s964_s6 = scalar_lea.vmem %s963_s14, 128  ;;  %p965_p11 = scmp.lt.s32.totalorder %s476_s15, %s963_s14 }
 0x14d   : > { %p966_p0 = scmp.lt.s32.totalorder %s964_s6, %s958_s0 }
 0x14e   : > { %430 = vrot.lane.b32.xlu0 %v358_v6, %s1063_s17  ;;  %385 = vrot.lane.b32.xlu1 %v363_v10, %s1059_s30 }
 0x14f   : > { %p967_p5 = por %p966_p0, %p965_p11 }
 0x151   : > { %p968_p9 = pnand %p967_p5, %p961_p12 }
 0x153   : > { %971 = shalt.err (!%p968_p9)
}
 0x154   : > { %s972_s30 = scalar_lea.hbm %s1284_s9, 64  ;;  %s976_s28 = scalar_lea.hbm %s1410_s3, 128 }
 0x155   : > { %p973_p1 = scmp.ne.s32.totalorder %s1284_s9, %s972_s30  ;;  %p977_p3 = scmp.lt.u32.totalorder %s1284_s9, %s1410_s3 }
 0x156   : > { %p978_p13 = scmp.lt.u32.totalorder %s976_s28, %s972_s30  ;;  %p980_p6 = scmp.lt.u32.totalorder %s972_s30, %s1284_s9 }
 0x157   : > { %p974_p2 = pnand %p973_p1, %p1202_p10 }
 0x158   : > { %p979_p4 = por %p978_p13, %p977_p3 }
 0x159   : > { %p975_p7 = pneg %p974_p2 }
 0x15a   : > { %p981_p8 = por %p980_p6, %p979_p4 }
 0x15c   : > { %p982_p12 = pnand %p981_p8, %p975_p7 }
 0x15e   : > { %985 = shalt.err (!%p982_p12)
}
 0x15f   : > { %784 = dma.vmem_to_hbm [thread:$0]  (%p1202_p10), %s476_s15, 64, %s1284_s9, %s451_s29   ;;  %400 = vrot.lane.b32.xlu0 %v363_v10, %s1061_s12  ;;  %vm370_vm3 = vcmask 64512   ;;  %vm383_vm4 = vcmask 60416  }
 0x160   : > { %s1435_s0 = smov 56   ;;  %s1436_s6 = smov 80  }
 0x161   : > { %405 = vrot.lane.b32.xlu1 %v363_v10, %s1435_s0  ;;  %s1437_s10 = smov 48   ;;  %s1438_s30 = smov 40  }
 0x162   : > { %s734_s26 = sshll.u32 %s1255_s25, 6 }
 0x163   : > { %420 = vrot.lane.b32.xlu0 %v363_v10, %s1436_s6  ;;  %s1312_s28 = scalar_lea.vmem [#allocation10], %s734_s26 }
 0x165   : > { %425 = vrot.lane.b32.xlu1 %v363_v10, %s1437_s10 }
 0x167   : > { %440 = vrot.lane.b32.xlu0 %v363_v10, %s1063_s17  ;;  %s733_s17 = sshll.u32 %s1255_s25, 5  ;;  %s1341_s25 = scalar_lea.sflag [#allocation9], %s455_s16 }
 0x168   : > { %s286_s9 = scalar_lea.vmem [#allocation8], %s733_s17 }
 0x169   : > { %445 = vrot.lane.b32.xlu1 %v363_v10, %s1438_s30 }
 0x1b0   : > { %v396_v11 = vpop.permute.xlu1 %395  ;;  %v368_v12 = vpop.permute.xlu0 %367 }
 0x1b1   : > { %743 = vst.msk [vmem:[%s1312_s28 + $0x28] sm:$0xff] %vm370_vm3, %v396_v11  ;;  %371 = vst.msk [vmem:[%s1312_s28] sm:$0xff] %vm370_vm3, %v368_v12 }
 0x1b4   : > { %v416_v13 = vpop.permute.xlu1 %415  ;;  %v373_v14 = vpop.permute.xlu0 %372 }
 0x1b5   : > { %747 = vst.msk [vmem:[%s1312_s28 + $0x30] sm:$0xff] %vm370_vm3, %v416_v13  ;;  %739 = vst.msk [vmem:[%s1312_s28 + $0x20] sm:$0xff] %vm370_vm3, %v373_v14 }
 0x1b8   : > { %v436_v15 = vpop.permute.xlu1 %435  ;;  %v391_v16 = vpop.permute.xlu0 %390 }
 0x1b9   : > { %751 = vst.msk [vmem:[%s1312_s28 + $0x38] sm:$0xff] %vm370_vm3, %v436_v15  ;;  %742 = vst.msk [vmem:[%s1312_s28 + $0x8] sm:$0xff] %vm370_vm3, %v391_v16 }
 0x1bc   : > { %v411_v17 = vpop.permute.xlu0 %410  ;;  %v381_v18 = vpop.permute.xlu1 %380 }
 0x1bd   : > { %746 = vst.msk [vmem:[%s1312_s28 + $0x10] sm:$0xff] %vm370_vm3, %v411_v17 }
 0x1be   : > { %384 = vst.msk [vmem:[%s286_s9] sm:$0xf] %vm383_vm4, %v381_v18 }
 0x1c0   : > { %v431_v19 = vpop.permute.xlu0 %430  ;;  %v386_v20 = vpop.permute.xlu1 %385 }
 0x1c1   : > { %750 = vst.msk [vmem:[%s1312_s28 + $0x18] sm:$0xff] %vm370_vm3, %v431_v19 }
 0x1c2   : > { %741 = vst.msk [vmem:[%s286_s9 + $0x10] sm:$0xf] %vm383_vm4, %v386_v20 }
 0x1d1   : > { %v401_v21 = vpop.permute.xlu0 %400 }
 0x1d2   : > { %744 = vst.msk [vmem:[%s286_s9 + $0x4] sm:$0xf] %vm383_vm4, %v401_v21 }
 0x1d3   : > { %v406_v22 = vpop.permute.xlu1 %405 }
 0x1d4   : > { %745 = vst.msk [vmem:[%s286_s9 + $0x14] sm:$0xf] %vm383_vm4, %v406_v22 }
 0x1d5   : > { %v421_v23 = vpop.permute.xlu0 %420 }
 0x1d6   : > { %748 = vst.msk [vmem:[%s286_s9 + $0x8] sm:$0xf] %vm383_vm4, %v421_v23 }
 0x1d7   : > { %v426_v24 = vpop.permute.xlu1 %425 }
 0x1d8   : > { %749 = vst.msk [vmem:[%s286_s9 + $0x18] sm:$0xf] %vm383_vm4, %v426_v24 }
 0x1d9   : > { %v441_v25 = vpop.permute.xlu0 %440 }
 0x1da   : > { %752 = vst.msk [vmem:[%s286_s9 + $0xc] sm:$0xf] %vm383_vm4, %v441_v25 }
 0x1db   : > { %v446_v26 = vpop.permute.xlu1 %445 }
 0x1dc   : > { %753 = vst.msk [vmem:[%s286_s9 + $0x1c] sm:$0xf] %vm383_vm4, %v446_v26 }
 0x1dd   : > { %s765_s29 = sshll.u32 %s1040_s21, 8  ;;  %s505_s12 = sshll.u32 %s286_s9, 4  ;;  %s506_s12 = int_to_ptr.vmem [resolvable:$true] %s505_s12 }
 0x1de   : > { %s488_s14 = scalar_lea.hbm %s1411_s4, %s765_s29  ;;  %s1065_s0 = smov 256  }
 0x1df   : > { %785 = sst [smem:[#allocation12]] (%p1202_p10), %s1065_s0  ;;  %s1066_s24 = smov 512  }
 0x1e0   : > { %786 = sst [smem:[#allocation12 + $0x1]] (%p1202_p10), %s1066_s24  ;;  %s1067_s16 = smov 4  }
 0x1e1   : > { %787 = sst [smem:[#allocation12 + $0x2]] (%p1202_p10), %s1067_s16  ;;  %s1068_s6 = smov 64  }
 0x1e2   : > { %788 = sst [smem:[#allocation12 + $0x3]] (%p1202_p10), %s1068_s6  ;;  %s1069_s10 = smov [#allocation11]  }
 0x1e3   : > { %789 = sst [smem:[#allocation12 + $0x4]] (%p1202_p10), %s1068_s6  ;;  %s1070_s30 = smov 0  }
 0x1e4   : > { %790 = sst [smem:[#allocation12 + $0x5]] (%p1202_p10), %s1067_s16 }
 0x1e5   : > { %791 = dma.general (%p1202_p10), %s506_s12, 512, %s488_s14, %s1341_s25, %s1069_s10, [#allocation12], %s1070_s30, 0  }
 0x1e6   : > { %s766_s26 = sshll.u32 %s1040_s21, 9  ;;  %s551_s17 = sshll.u32 %s1312_s28, 4  ;;  %s552_s17 = int_to_ptr.vmem [resolvable:$true] %s551_s17 }
 0x1e7   : > { %s534_s15 = scalar_lea.hbm %s1412_s5, %s766_s26  ;;  %s1071_s8 = smov 512  }
 0x1e8   : > { %792 = sst [smem:[#allocation14]] (%p1202_p10), %s1071_s8  ;;  %s1072_s12 = smov 1024  }
 0x1e9   : > { %793 = sst [smem:[#allocation14 + $0x1]] (%p1202_p10), %s1072_s12  ;;  %s1073_s14 = smov 4  }
 0x1ea   : > { %794 = sst [smem:[#allocation14 + $0x2]] (%p1202_p10), %s1073_s14  ;;  %s1074_s0 = smov 128  }
 0x1eb   : > { %795 = sst [smem:[#allocation14 + $0x3]] (%p1202_p10), %s1074_s0  ;;  %s1075_s21 = smov 8  }
 0x1ec   : > { %796 = sst [smem:[#allocation14 + $0x4]] (%p1202_p10), %s1074_s0  ;;  %s1076_s28 = smov [#allocation13]  }
 0x1ed   : > { %797 = sst [smem:[#allocation14 + $0x5]] (%p1202_p10), %s1075_s21  ;;  %s1077_s24 = smov 0  }
 0x1ee   : > { %798 = dma.general (%p1202_p10), %s552_s17, 1024, %s534_s15, %s1341_s25, %s1076_s28, [#allocation14], %s1077_s24, 0  }
 0x1ef PF: > { %s579_s16 = sand.u32 1, %s1028_s18   ;;  %p1439_p11 = scmp.ne.s32.totalorder %s1423_s27, 0 }
 0x1f0   : > { %p1440_p0 = scmp.ge.s32.totalorder %s1048_s23, 2  ;;  %s580_s6 = scalar_lea.sflag [#allocation4], %s579_s16 }
 0x1f2   : > { %p811_p5 = pnand %p1440_p0, %p1439_p11 }
 0x1f4   : > { %1019 = dma.done.wait (!%p811_p5), %s580_s6, 64  }
 0x1f5   : > { %1021 = vsyncadd (!%p811_p5), %s580_s6, 4294967232  ;;  %s1441_s10 = sadd.s32 4294967294, %s1048_s23  }
 0x1f6   : > { %s588_s30 = sand.u32 1, %s1441_s10  }
 0x1f7   : > { %s589_s26 = scalar_lea.sflag [#allocation9], %s588_s30 }
 0x1f8   : > { %1023 = dma.done.wait (!%p811_p5), %s589_s26, 1536  }
 0x1f9   : > { %1025 = vsyncadd (!%p811_p5), %s589_s26, 4294965760  ;;  %s26_s23 = sadd.s32 1, %s1048_s23   ;;  %s1442_s18 = smov %s1032_s19 }
 0x1fa   : > { %p23_p10 = scmp.ge.s32.totalorder %s26_s23, 4   ;;  %s1443_s19 = smov %s1036_s20 }
 0x1fb   : > { %s1444_s20 = smov %s1211_s13  ;;  %s1445_s21 = smov %s1044_s22 }
 0x1fc   : > { %s1446_s22 = smov %s1448_s7  ;;  %25 = sbr.rel (!%p23_p10) target bundleno = 11 (0xb), region = 137 }
 0x203   :  { %603 = vsyncpa [#allocation3], 1 }
 0x204   :  { %605 = vsyncpa [#allocation3 + $0x1], 1 }
 0x205   :  { %606 = vsyncpa [#allocation6], 1 }
 0x206   :  { %607 = vsyncpa [#allocation4], 1 }
 0x207   :  { %609 = vsyncpa [#allocation4 + $0x1], 1 }
 0x208   :  { %610 = vsyncpa [#allocation9], 1 }
 0x209   :  { %612 = vsyncpa [#allocation9 + $0x1], 1 }

</bundles_post_ra>
